<compile_context>
chip_gen: v6e
topology: v6e:2x2x1
jax: 0.10.0
libtpu: 0.0.40
codegen_flags: <defaults>
</compile_context>

<pallas_src>
import functools

import jax
import jax.numpy as jnp
from jax.experimental import pallas as pl
from jax.experimental.pallas import tpu as pltpu


def _conv_bn_lrelu_kernel(x_ref, w_ref, b_ref, o_ref, col_ref, *,
                          kh, kw, sh, sw, BH, OW, F):
    """One (batch image, output-row band) per grid step.

    x_ref:   (1, Hp, Wp, C)  zero-padded NHWC image (bf16), revisited across bands
    w_ref:   (K, Fp)         BN-scale-folded weights (bf16), K = kh*kw*C
    b_ref:   (1, Fp)         folded BN bias (f32)
    o_ref:   (1, BM, F)      fused output band (bf16), channels unpadded
    col_ref: (BM, K)         im2col scratch (bf16), BM = BH*OW
    """
    C = x_ref.shape[-1]
    BM = BH * OW
    b = pl.program_id(1)
    row0 = b * (BH * sh)          # first padded input row touched by this band

    # --- build the im2col LHS once (single materialization) -----------------
    for i in range(kh):
        if sh > 1:
            rows = pl.ds(row0 + i, BH, stride=sh)
        else:
            rows = pl.ds(row0 + i, BH)
        for j in range(kw):
            if sw > 1:
                cols = pl.ds(j, OW, stride=sw)
            else:
                cols = pl.ds(j, OW)
            tap = i * kw + j
            win = x_ref[0, rows, cols, :]                 # (BH, OW, C) bf16
            col_ref[:, tap * C:(tap + 1) * C] = win.reshape(BM, C)

    # --- one fused-K MXU contraction + f32 epilogue --------------------------
    acc = jnp.dot(col_ref[...], w_ref[...], preferred_element_type=jnp.float32)
    y = acc + b_ref[...]                                  # folded BN bias
    y = jnp.where(y > 0, y, 0.1 * y)                      # LeakyReLU(0.1)
    o_ref[0] = y[:, :F].astype(o_ref.dtype)


def _pick_band(OH, OW, N):
    """Output rows per band: BM=BH*OW moderate, >=8 grid steps when possible."""
    divisors = [d for d in range(1, OH + 1) if OH % d == 0]
    valid = [d for d in divisors if (d * OW) % 8 == 0 or d == OH]
    cands = [d for d in valid if d * OW <= 512] or [min(valid)]
    BH = max(cands)
    while N * (OH // BH) < 8:
        smaller = [d for d in valid if d < BH]
        if not smaller:
            break
        BH = max(smaller)
    return BH


def conv2d_unit_forward(x, weight, gamma, beta, running_mean, running_var,
                        stride, padding, eps=1e-5,
                        compute_dtype=jnp.bfloat16, out_store_dtype=jnp.bfloat16):
    """x: [N, C, H, W] f32; weight: [F, C, kh, kw] f32. Returns [N, F, OH, OW] f32."""
    N, C, H, W = x.shape
    F, _, kh, kw = weight.shape
    sh, sw = stride
    ph, pw = padding
    OH = (H + 2 * ph - kh) // sh + 1
    OW = (W + 2 * pw - kw) // sw + 1
    Hp, Wp = H + 2 * ph, W + 2 * pw
    M = OH * OW
    K = kh * kw * C

    # MXU-friendly padded channel width for the weights / dot only (output is
    # stored unpadded).  v6e/v7x MXUs are 2x256^2 -> 256-align once F > 128.
    if F > 128:
        Fp = ((F + 255) // 256) * 256
    else:
        Fp = ((F + 127) // 128) * 128

    BH = _pick_band(OH, OW, N)
    n_bands = OH // BH
    BM = BH * OW

    # ---- host-side prep (transpose + pad + bf16 cast fuse into one pass) ----
    # TODO(synk): accept/produce NHWC end-to-end to drop both transposes.
    x_nhwc = jnp.transpose(x, (0, 2, 3, 1))
    x_pad = jnp.pad(x_nhwc, ((0, 0), (ph, ph), (pw, pw), (0, 0))).astype(compute_dtype)

    # Fold eval-mode BN scale into the conv weights; only a bias stream remains.
    scale = gamma / jnp.sqrt(running_var + eps)                   # (F,)
    bias = beta - running_mean * scale                            # (F,)
    w_folded = weight * scale[:, None, None, None]                # (F, C, kh, kw)
    w_mat = jnp.transpose(w_folded, (2, 3, 1, 0)).reshape(K, F)   # row = (i*kw+j)*C + c
    w_mat = jnp.pad(w_mat, ((0, 0), (0, Fp - F))).astype(compute_dtype)
    bias_p = jnp.pad(bias, (0, Fp - F)).reshape(1, Fp).astype(jnp.float32)

    # ---- VMEM budget (cap below v7x's 64 MiB physical for compiler headroom) -
    it = jnp.dtype(compute_dtype).itemsize
    ot = jnp.dtype(out_store_dtype).itemsize
    footprint = (2 * Hp * Wp * C * it            # double-buffered padded image
                 + 2 * K * Fp * it + 2 * Fp * 4  # weights + bias (grid-invariant)
                 + 2 * BM * F * ot               # double-buffered output band
                 + BM * K * it                   # im2col scratch
                 + 2 * BM * Fp * 4)              # dot result / epilogue temporaries
    vmem_limit = int(min(48 * 2**20, max(32 * 2**20, 2 * footprint)))

    kernel = functools.partial(_conv_bn_lrelu_kernel,
                               kh=kh, kw=kw, sh=sh, sw=sw, BH=BH, OW=OW, F=F)

    out = pl.pallas_call(
        kernel,
        out_shape=jax.ShapeDtypeStruct((N, M, F), out_store_dtype),
        grid_spec=pltpu.PrefetchScalarGridSpec(
            num_scalar_prefetch=0,
            grid=(N, n_bands),                     # band axis innermost -> image re-fetch skipped
            in_specs=[
                pl.BlockSpec((1, Hp, Wp, C), lambda n, b: (n, 0, 0, 0)),
                pl.BlockSpec((K, Fp), lambda n, b: (0, 0)),    # grid-invariant
                pl.BlockSpec((1, Fp), lambda n, b: (0, 0)),    # grid-invariant
            ],
            out_specs=pl.BlockSpec((1, BM, F), lambda n, b: (n, b, 0)),
            scratch_shapes=[pltpu.VMEM((BM, K), compute_dtype)],
        ),
        compiler_params=pltpu.CompilerParams(
            dimension_semantics=("parallel", "parallel"),
            vmem_limit_bytes=vmem_limit),
    )(x_pad, w_mat, bias_p)

    out = out.reshape(N, OH, OW, F).astype(jnp.float32)
    return jnp.transpose(out, (0, 3, 1, 2))                       # back to NCHW


def _reference(x, weight, gamma, beta, running_mean, running_var, stride, padding, eps=1e-5):
    y = jax.lax.conv_general_dilated(
        x, weight, window_strides=stride,
        padding=[(padding[0], padding[0]), (padding[1], padding[1])],
        dimension_numbers=("NCHW", "OIHW", "NCHW"))
    scale = (gamma / jnp.sqrt(running_var + eps)).reshape(1, -1, 1, 1)
    bias = (beta - running_mean * gamma / jnp.sqrt(running_var + eps)).reshape(1, -1, 1, 1)
    y = y * scale + bias
    return jnp.where(y > 0, y, 0.1 * y)


if __name__ == "__main__":
    # Conv2dUnit(input_dim=4, filters=8, kernels=(3,3), stride=(1,1), padding=(1,1))
    N, C, H, W = 2, 4, 16, 16
    filters, kernels, stride, padding = 8, (3, 3), (1, 1), (1, 1)

    key = jax.random.PRNGKey(0)
    kx, kw_, kg, kb, km, kv = jax.random.split(key, 6)
    x = jax.random.normal(kx, (N, C, H, W), dtype=jnp.float32)
    weight = 0.01 * jax.random.normal(kw_, (filters, C, kernels[0], kernels[1]), dtype=jnp.float32)
    gamma = 0.01 * jax.random.normal(kg, (filters,), dtype=jnp.float32)
    beta = 0.01 * jax.random.normal(kb, (filters,), dtype=jnp.float32)
    running_mean = 0.01 * jax.random.normal(km, (filters,), dtype=jnp.float32)
    running_var = jnp.abs(0.01 * jax.random.normal(kv, (filters,), dtype=jnp.float32))

    fwd = jax.jit(functools.partial(conv2d_unit_forward, stride=stride, padding=padding))
    out = fwd(x, weight, gamma, beta, running_mean, running_var)
    out = jax.block_until_ready(out)

    ref = _reference(x, weight, gamma, beta, running_mean, running_var, stride, padding)
    assert out.shape == (N, filters, H, W)
    # bf16 operands + bf16 store (f32 MXU accumulation / f32 epilogue) -> loose tolerance.
    assert jnp.allclose(out, ref, atol=5e-3, rtol=3e-2), float(jnp.max(jnp.abs(out - ref)))
    print("KERNEL_OK")
</pallas_src>

<mosaic_0001>
module attributes {stable_mosaic.version = 11 : i64} {
  func.func @_conv_bn_lrelu_kernel(%arg0: i32, %arg1: i32, %arg2: memref<1x18x18x4xbf16, #tpu.memory_space<vmem>>, %arg3: memref<36x128xbf16, #tpu.memory_space<vmem>>, %arg4: memref<1x128xf32, #tpu.memory_space<vmem>>, %arg5: memref<1x64x8xbf16, #tpu.memory_space<vmem>>, %arg6: memref<64x36xbf16, #tpu.memory_space<vmem>>) attributes {dimension_semantics = [#tpu.dimension_semantics<parallel>, #tpu.dimension_semantics<parallel>], iteration_bounds = array<i64: 2, 4>, scalar_prefetch = 0 : i64, scratch_operands = 1 : i64, tpu.core_type = #tpu.core_type<tc>, window_params = [{transform_indices = @transform_0, window_bounds = array<i64: 1, 18, 18, 4>}, {pipeline_mode = #tpu.pipeline_mode<synchronous>, transform_indices = @transform_1, window_bounds = array<i64: 36, 128>}, {pipeline_mode = #tpu.pipeline_mode<synchronous>, transform_indices = @transform_2, window_bounds = array<i64: 1, 128>}, {transform_indices = @transform_3, window_bounds = array<i64: 1, 64, 8>}]} {
    %c4_i32 = arith.constant 4 : i32
    %0 = arith.muli %arg1, %c4_i32 : i32
    %c0_i32 = arith.constant 0 : i32
    %1 = arith.addi %0, %c0_i32 : i32
    %c0 = arith.constant 0 : index
    %2 = arith.index_cast %1 : i32 to index
    %c0_0 = arith.constant 0 : index
    %c0_1 = arith.constant 0 : index
    %3 = vector.load %arg2[%c0, %2, %c0_0, %c0_1] : memref<1x18x18x4xbf16, #tpu.memory_space<vmem>>, vector<1x4x16x4xbf16>
    %4 = vector.shape_cast %3 : vector<1x4x16x4xbf16> to vector<4x16x4xbf16>
    %5 = vector.shape_cast %4 : vector<4x16x4xbf16> to vector<64x4xbf16>
    %c0_2 = arith.constant 0 : index
    %c0_3 = arith.constant 0 : index
    %6 = vector.load %arg6[%c0_2, %c0_3] : memref<64x36xbf16, #tpu.memory_space<vmem>>, vector<64x4xbf16>
    tpu.vector_store %arg6[%c0_2, %c0_3], %5 {strides = array<i32>} : memref<64x36xbf16, #tpu.memory_space<vmem>>, vector<64x4xbf16>,
    %c0_4 = arith.constant 0 : index
    %7 = arith.index_cast %1 : i32 to index
    %c1 = arith.constant 1 : index
    %c0_5 = arith.constant 0 : index
    %8 = vector.load %arg2[%c0_4, %7, %c1, %c0_5] : memref<1x18x18x4xbf16, #tpu.memory_space<vmem>>, vector<1x4x16x4xbf16>
    %9 = vector.shape_cast %8 : vector<1x4x16x4xbf16> to vector<4x16x4xbf16>
    %10 = vector.shape_cast %9 : vector<4x16x4xbf16> to vector<64x4xbf16>
    %c0_6 = arith.constant 0 : index
    %c4 = arith.constant 4 : index
    %11 = vector.load %arg6[%c0_6, %c4] : memref<64x36xbf16, #tpu.memory_space<vmem>>, vector<64x4xbf16>
    tpu.vector_store %arg6[%c0_6, %c4], %10 {strides = array<i32>} : memref<64x36xbf16, #tpu.memory_space<vmem>>, vector<64x4xbf16>,
    %c0_7 = arith.constant 0 : index
    %12 = arith.index_cast %1 : i32 to index
    %c2 = arith.constant 2 : index
    %c0_8 = arith.constant 0 : index
    %13 = vector.load %arg2[%c0_7, %12, %c2, %c0_8] : memref<1x18x18x4xbf16, #tpu.memory_space<vmem>>, vector<1x4x16x4xbf16>
    %14 = vector.shape_cast %13 : vector<1x4x16x4xbf16> to vector<4x16x4xbf16>
    %15 = vector.shape_cast %14 : vector<4x16x4xbf16> to vector<64x4xbf16>
    %c0_9 = arith.constant 0 : index
    %c8 = arith.constant 8 : index
    %16 = vector.load %arg6[%c0_9, %c8] : memref<64x36xbf16, #tpu.memory_space<vmem>>, vector<64x4xbf16>
    tpu.vector_store %arg6[%c0_9, %c8], %15 {strides = array<i32>} : memref<64x36xbf16, #tpu.memory_space<vmem>>, vector<64x4xbf16>,
    %c1_i32 = arith.constant 1 : i32
    %17 = arith.addi %0, %c1_i32 : i32
    %c0_10 = arith.constant 0 : index
    %18 = arith.index_cast %17 : i32 to index
    %c0_11 = arith.constant 0 : index
    %c0_12 = arith.constant 0 : index
    %19 = vector.load %arg2[%c0_10, %18, %c0_11, %c0_12] : memref<1x18x18x4xbf16, #tpu.memory_space<vmem>>, vector<1x4x16x4xbf16>
    %20 = vector.shape_cast %19 : vector<1x4x16x4xbf16> to vector<4x16x4xbf16>
    %21 = vector.shape_cast %20 : vector<4x16x4xbf16> to vector<64x4xbf16>
    %c0_13 = arith.constant 0 : index
    %c12 = arith.constant 12 : index
    %22 = vector.load %arg6[%c0_13, %c12] : memref<64x36xbf16, #tpu.memory_space<vmem>>, vector<64x4xbf16>
    tpu.vector_store %arg6[%c0_13, %c12], %21 {strides = array<i32>} : memref<64x36xbf16, #tpu.memory_space<vmem>>, vector<64x4xbf16>,
    %c0_14 = arith.constant 0 : index
    %23 = arith.index_cast %17 : i32 to index
    %c1_15 = arith.constant 1 : index
    %c0_16 = arith.constant 0 : index
    %24 = vector.load %arg2[%c0_14, %23, %c1_15, %c0_16] : memref<1x18x18x4xbf16, #tpu.memory_space<vmem>>, vector<1x4x16x4xbf16>
    %25 = vector.shape_cast %24 : vector<1x4x16x4xbf16> to vector<4x16x4xbf16>
    %26 = vector.shape_cast %25 : vector<4x16x4xbf16> to vector<64x4xbf16>
    %c0_17 = arith.constant 0 : index
    %c16 = arith.constant 16 : index
    %27 = vector.load %arg6[%c0_17, %c16] : memref<64x36xbf16, #tpu.memory_space<vmem>>, vector<64x4xbf16>
    tpu.vector_store %arg6[%c0_17, %c16], %26 {strides = array<i32>} : memref<64x36xbf16, #tpu.memory_space<vmem>>, vector<64x4xbf16>,
    %c0_18 = arith.constant 0 : index
    %28 = arith.index_cast %17 : i32 to index
    %c2_19 = arith.constant 2 : index
    %c0_20 = arith.constant 0 : index
    %29 = vector.load %arg2[%c0_18, %28, %c2_19, %c0_20] : memref<1x18x18x4xbf16, #tpu.memory_space<vmem>>, vector<1x4x16x4xbf16>
    %30 = vector.shape_cast %29 : vector<1x4x16x4xbf16> to vector<4x16x4xbf16>
    %31 = vector.shape_cast %30 : vector<4x16x4xbf16> to vector<64x4xbf16>
    %c0_21 = arith.constant 0 : index
    %c20 = arith.constant 20 : index
    %32 = vector.load %arg6[%c0_21, %c20] : memref<64x36xbf16, #tpu.memory_space<vmem>>, vector<64x4xbf16>
    tpu.vector_store %arg6[%c0_21, %c20], %31 {strides = array<i32>} : memref<64x36xbf16, #tpu.memory_space<vmem>>, vector<64x4xbf16>,
    %c2_i32 = arith.constant 2 : i32
    %33 = arith.addi %0, %c2_i32 : i32
    %c0_22 = arith.constant 0 : index
    %34 = arith.index_cast %33 : i32 to index
    %c0_23 = arith.constant 0 : index
    %c0_24 = arith.constant 0 : index
    %35 = vector.load %arg2[%c0_22, %34, %c0_23, %c0_24] : memref<1x18x18x4xbf16, #tpu.memory_space<vmem>>, vector<1x4x16x4xbf16>
    %36 = vector.shape_cast %35 : vector<1x4x16x4xbf16> to vector<4x16x4xbf16>
    %37 = vector.shape_cast %36 : vector<4x16x4xbf16> to vector<64x4xbf16>
    %c0_25 = arith.constant 0 : index
    %c24 = arith.constant 24 : index
    %38 = vector.load %arg6[%c0_25, %c24] : memref<64x36xbf16, #tpu.memory_space<vmem>>, vector<64x4xbf16>
    tpu.vector_store %arg6[%c0_25, %c24], %37 {strides = array<i32>} : memref<64x36xbf16, #tpu.memory_space<vmem>>, vector<64x4xbf16>,
    %c0_26 = arith.constant 0 : index
    %39 = arith.index_cast %33 : i32 to index
    %c1_27 = arith.constant 1 : index
    %c0_28 = arith.constant 0 : index
    %40 = vector.load %arg2[%c0_26, %39, %c1_27, %c0_28] : memref<1x18x18x4xbf16, #tpu.memory_space<vmem>>, vector<1x4x16x4xbf16>
    %41 = vector.shape_cast %40 : vector<1x4x16x4xbf16> to vector<4x16x4xbf16>
    %42 = vector.shape_cast %41 : vector<4x16x4xbf16> to vector<64x4xbf16>
    %c0_29 = arith.constant 0 : index
    %c28 = arith.constant 28 : index
    %43 = vector.load %arg6[%c0_29, %c28] : memref<64x36xbf16, #tpu.memory_space<vmem>>, vector<64x4xbf16>
    tpu.vector_store %arg6[%c0_29, %c28], %42 {strides = array<i32>} : memref<64x36xbf16, #tpu.memory_space<vmem>>, vector<64x4xbf16>,
    %c0_30 = arith.constant 0 : index
    %44 = arith.index_cast %33 : i32 to index
    %c2_31 = arith.constant 2 : index
    %c0_32 = arith.constant 0 : index
    %45 = vector.load %arg2[%c0_30, %44, %c2_31, %c0_32] : memref<1x18x18x4xbf16, #tpu.memory_space<vmem>>, vector<1x4x16x4xbf16>
    %46 = vector.shape_cast %45 : vector<1x4x16x4xbf16> to vector<4x16x4xbf16>
    %47 = vector.shape_cast %46 : vector<4x16x4xbf16> to vector<64x4xbf16>
    %c0_33 = arith.constant 0 : index
    %c32 = arith.constant 32 : index
    %48 = vector.load %arg6[%c0_33, %c32] : memref<64x36xbf16, #tpu.memory_space<vmem>>, vector<64x4xbf16>
    tpu.vector_store %arg6[%c0_33, %c32], %47 {strides = array<i32>} : memref<64x36xbf16, #tpu.memory_space<vmem>>, vector<64x4xbf16>,
    %c0_34 = arith.constant 0 : index
    %c0_35 = arith.constant 0 : index
    %49 = vector.load %arg6[%c0_34, %c0_35] : memref<64x36xbf16, #tpu.memory_space<vmem>>, vector<64x36xbf16>
    %c0_36 = arith.constant 0 : index
    %c0_37 = arith.constant 0 : index
    %50 = vector.load %arg3[%c0_36, %c0_37] : memref<36x128xbf16, #tpu.memory_space<vmem>>, vector<36x128xbf16>
    %cst = arith.constant dense<0.000000e+00> : vector<64x128xf32>
    %51 = tpu.matmul %49, %50, %cst {dimension_numbers = #tpu.dot_dimension_numbers<[1], [0], [0], [1], [0, 0, 1, 1], [], []>} : vector<64x36xbf16>, vector<36x128xbf16>, vector<64x128xf32> -> vector<64x128xf32>
    %c0_38 = arith.constant 0 : index
    %c0_39 = arith.constant 0 : index
    %52 = vector.load %arg4[%c0_38, %c0_39] : memref<1x128xf32, #tpu.memory_space<vmem>>, vector<1x128xf32>
    %53 = vector.broadcast %52 : vector<1x128xf32> to vector<64x128xf32>
    %54 = arith.addf %51, %53 : vector<64x128xf32>
    %cst_40 = arith.constant 0.000000e+00 : f32
    %55 = vector.broadcast %cst_40 : f32 to vector<64x128xf32>
    %56 = arith.cmpf ogt, %54, %55 : vector<64x128xf32>
    %cst_41 = arith.constant 1.000000e-01 : f32
    %57 = vector.broadcast %cst_41 : f32 to vector<64x128xf32>
    %58 = arith.mulf %57, %54 : vector<64x128xf32>
    %59 = arith.select %56, %54, %58 : vector<64x128xi1>, vector<64x128xf32>
    %60 = vector.extract_strided_slice %59 {offsets = [0, 0], sizes = [64, 8], strides = [1, 1]} : vector<64x128xf32> to vector<64x8xf32>
    %61 = arith.truncf %60 : vector<64x8xf32> to vector<64x8xbf16>
    %c0_42 = arith.constant 0 : index
    %c0_43 = arith.constant 0 : index
    %c0_44 = arith.constant 0 : index
    %62 = vector.load %arg5[%c0_42, %c0_43, %c0_44] : memref<1x64x8xbf16, #tpu.memory_space<vmem>>, vector<1x64x8xbf16>
    %63 = vector.shape_cast %62 : vector<1x64x8xbf16> to vector<64x8xbf16>
    %64 = vector.shape_cast %61 : vector<64x8xbf16> to vector<1x64x8xbf16>
    tpu.vector_store %arg5[%c0_42, %c0_43, %c0_44], %64 {strides = array<i32>} : memref<1x64x8xbf16, #tpu.memory_space<vmem>>, vector<1x64x8xbf16>,
    return
  }
  func.func @transform_0(%arg0: i32, %arg1: i32) -> (i32, i32, i32, i32) {
    %c0_i32 = arith.constant 0 : i32
    %c0_i32_0 = arith.constant 0 : i32
    %c0_i32_1 = arith.constant 0 : i32
    %c0_i32_2 = arith.constant 0 : i32
    return %arg0, %c0_i32, %c0_i32_0, %c0_i32_1 : i32, i32, i32, i32
  }
  func.func @transform_1(%arg0: i32, %arg1: i32) -> (i32, i32) {
    %c0_i32 = arith.constant 0 : i32
    %c0_i32_0 = arith.constant 0 : i32
    %c0_i32_1 = arith.constant 0 : i32
    return %c0_i32, %c0_i32_0 : i32, i32
  }
  func.func @transform_2(%arg0: i32, %arg1: i32) -> (i32, i32) {
    %c0_i32 = arith.constant 0 : i32
    %c0_i32_0 = arith.constant 0 : i32
    %c0_i32_1 = arith.constant 0 : i32
    return %c0_i32, %c0_i32_0 : i32, i32
  }
  func.func @transform_3(%arg0: i32, %arg1: i32) -> (i32, i32, i32) {
    %c0_i32 = arith.constant 0 : i32
    %c0_i32_0 = arith.constant 0 : i32
    return %arg0, %arg1, %c0_i32 : i32, i32, i32
  }
}

</mosaic_0001>

<bundles_post_ra>
// kernel: conv2d_unit_forward.1
= control target key start
LH: loop header
LB: loop body
LE: loop exit
PB: predicated region body
PF: predicated region fallthrough
CT: control target
= control target key end

     0   :  { %s1578_s12 = smov 0   ;;  %s1580_s13 = smov 0   ;;  %s2023_s0 = inlined_call_operand.vmem [shape: bf16[2,18,18,4], index: 0, kind: input, shape index: {}]   ;;  %s2024_s1 = inlined_call_operand.vmem [shape: bf16[36,128], index: 1, kind: input, shape index: {}]   ;;  %s2025_s2 = inlined_call_operand.vmem [shape: f32[1,128], index: 2, kind: input, shape index: {}]   ;;  %s2026_s3 = inlined_call_operand.vmem [shape: bf16[2,256,8], index: 3, kind: output, shape index: {}]  }
   0x1   :  { %s1582_s14 = smov 0   ;;  %s1584_s15 = smov 0  }
   0x2   :  { %s1586_s16 = smov 0  }
   0x3 LB: > { %s22_s17 = sadd.s32 1, %s1540_s14  ;;  %s25_s18 = sadd.s32 1, %s1544_s15  ;;  %s1548_s16 = sphi %s1586_s16, %s13_s16   ;;  %s1544_s15 = sphi %s1584_s15, %s2034_s15   ;;  %s1540_s14 = sphi %s1582_s14, %s2033_s14   ;;  %s1536_s13 = sphi %s1580_s13, %s2032_s13   ;;  %s1532_s12 = sphi %s1578_s12, %s2031_s12  }
   0x4   : > { %p23_p0 = scmp.ge.s32.totalorder %s22_s17, 4  ;;  %p1306_p1 = scmp.ge.s32.totalorder %s1548_s16, 1 }
   0x5   : > { %p151_p2 = scmp.lt.s32.totalorder %s1548_s16, 9 }
   0x6   : > { %s2036_s17 = smov (%p23_p0, %s22_s17), 0  ;;  %s2038_s18 = smov (!%p23_p0, %s25_s18), %s1544_s15 }
   0x7   : > { %p152_p3 = pnand %p1306_p1, %p151_p2  ;;  %p27_p4 = scmp.ge.s32.totalorder %s2038_s18, 2 }
   0x8   : > { %p179_p5 = scmp.lt.s32.totalorder (!%p152_p3), %s1536_s13, 1  ;;  %s1416_s19 = smul.u32 (!%p152_p3), 48, %s1532_s12 }
   0x9   : > { %s2040_s18 = smov (%p27_p4, %s2038_s18), 0  ;;  %155 = sbr.rel (%p152_p3) target bundleno = 483 (0x1e3), region = 32 }
   0xa   : > { %s1550_s25 = smov (!%p152_p3), 8   ;;  %s1551_s26 = smov (!%p152_p3), 4  }
   0xb   : > { %s1552_s27 = smov (!%p152_p3), 12   ;;  %s1553_s28 = smov (!%p152_p3), 16  }
   0xc   : > { %s1554_s29 = smov (!%p152_p3), 20   ;;  %s1555_s30 = smov (!%p152_p3), 24  }
   0xd   : > { %s1556_s4 = smov (!%p152_p3), 28   ;;  %s1557_s9 = smov (!%p152_p3), 32  }
   0xe   : > { %s2042_s13 = smov (!%p179_p5, %s1536_s13), 1  ;;  %vm384_vm0 = vcmask 1042432   ;;  %vm385_vm1 = vcmask 1046532   ;;  %vm228_vm3 = vsmask.f32 3328  ;;  %vm207_vm6 = vcmask 27648  }
   0xf   : > { %s1454_s20 = smul.u32 216, %s2042_s13  ;;  %vm1619_vm2 = vmor %vm384_vm0, %vm385_vm1  ;;  %vm229_vm4 = vsmask.f32 7440  ;;  %vm1074_vm7 = vcmask 1041408   ;;  %vm351_vm8 = vcmask 60448   ;;  %vm439_vm9 = vcmask 93248  }
  0x10   : > { %vm1641_vm5 = vmor %vm228_vm3, %vm229_vm4  ;;  %vm492_vm10 = vcmask 126048   ;;  %vm633_vm11 = vcmask 158848   ;;  %vm718_vm12 = vcmask 191648   ;;  %vm771_vm13 = vcmask 224448  }
  0x11   : > { %s183_s23 = scalar_lea.vmem %s2023_s0, %s1454_s20  ;;  %vm912_vm14 = vcmask 257248   ;;  %vm997_vm15 = vcmask 290048   ;;  %vm1061_vm0 = vcmask 293888   ;;  %s1309_s20 = sshll.u32 %s2042_s13, 5 }
  0x12   : > { %s1617_s24 = scalar_lea.vmem %s183_s23, %s1416_s19  ;;  %s1308_s19 = sshll.u32 %s1532_s12, 3 }
  0x13   : > { %v361_v1 = vld [vmem:[%s1617_s24 + $0x4] sm:$0xf]  ;;  %v362_v2 = vld [vmem:[%s1617_s24 + $0x8] sm:$0x1]  ;;  %v360_v3 = vld [vmem:[%s1617_s24] sm:$0xe] }
  0x14   : > { %v389_v4 = vrot.slane %v361_v1, 5  ;;  %v392_v5 = vrot.slane %v362_v2, 5  ;;  %v1314_v6 = vrot.slane %v360_v3, 9  ;;  %v222_v7 = vld [vmem:[%s1617_s24 + $0x18] sm:$0xf]  ;;  %p187_p6 = scmp.lt.s32.totalorder %s1308_s19, 31 }
  0x15   : > { %v223_v8 = vld [vmem:[%s1617_s24 + $0x1c] sm:$0xf]  ;;  %v280_v9 = vshrl.u32 %v222_v7, 16  ;;  %v283_v10 = vshll.u32 %v222_v7, 16  ;;  %v216_v11 = vld [vmem:[%s1617_s24] sm:$0xf] }
  0x16   : > { %v391_v12 = vrot.slane %v389_v4, 4  ;;  %v390_v13 = vsel %vm1619_vm2, %v1314_v6, %v389_v4  ;;  %v289_v14 = vshll.u32 %v223_v8, 16  ;;  %v293_v15 = vshrl.u32 %v223_v8, 16  ;;  %v217_v16 = vld [vmem:[%s1617_s24 + $0x4] sm:$0xf]  ;;  %s2044_s19 = smov (!%p187_p6, %s1308_s19), 31 }
  0x17   : > { %415 = vrot.lane.b32.xlu0 %v390_v13, %s1550_s25  ;;  %v282_v17 = vrot.slane %v280_v9, 4  ;;  %v285_v18 = vrot.slane %v283_v10, 5  ;;  %v232_v19 = vshrl.u32 %v216_v11, 16  ;;  %v235_v20 = vshll.u32 %v216_v11, 16  ;;  %v224_v21 = vld [vmem:[%s1617_s24 + $0x20] sm:$0x1]  ;;  %s190_s23 = sadd.s32 %s1309_s20, %s2044_s19 }
  0x18   : > { %v393_v22 = vsel %vm1619_vm2, %v391_v12, %v392_v5  ;;  %v291_v23 = vrot.slane %v289_v14, 5  ;;  %v241_v24 = vshll.u32 %v217_v16, 16  ;;  %v245_v25 = vshrl.u32 %v217_v16, 16  ;;  %v218_v26 = vld [vmem:[%s1617_s24 + $0x8] sm:$0x1] }
  0x19   : > { %417 = vrot.lane.b32.xlu1 %v393_v22, %s1550_s25  ;;  %v286_v27 = vor.u32 %v285_v18, %v282_v17  ;;  %v234_v28 = vrot.slane %v232_v19, 4  ;;  %v237_v29 = vrot.slane %v235_v20, 5  ;;  %v295_v30 = vrot.slane %v293_v15, 4  ;;  %v220_v31 = vld [vmem:[%s1617_s24 + $0x10] sm:$0xf] }
  0x1a   : > { %v243_v33 = vrot.slane %v241_v24, 5  ;;  %v299_v34 = vshll.u32 %v224_v21, 16  ;;  %v247_v35 = vrot.slane %v245_v25, 4  ;;  %v251_v36 = vshll.u32 %v218_v26, 16  ;;  %v221_v40 = vld [vmem:[%s1617_s24 + $0x14] sm:$0x1] }
  0x1b   : > { %v287_v37 = vrot.slane %v286_v27, 4  ;;  %v238_v38 = vor.u32 %v237_v29, %v234_v28  ;;  %v296_v39 = vor.u32 %v295_v30, %v291_v23  ;;  %v265_v41 = vshll.u32 %v220_v31, 16  ;;  %v219_v42 = vld [vmem:[%s1617_s24 + $0xc] sm:$0xf]  ;;  %v226_v47 = vld [vmem:[%s1617_s24 + $0x28] sm:$0xf] }
  0x1c   : > { %v301_v43 = vrot.slane %v299_v34, 5  ;;  %v248_v44 = vor.u32 %v247_v35, %v243_v33  ;;  %v253_v45 = vrot.slane %v251_v36, 5  ;;  %v269_v46 = vshrl.u32 %v220_v31, 16  ;;  %v227_v56 = vld [vmem:[%s1617_s24 + $0x2c] sm:$0x1] }
  0x1d   : > { %v292_v48 = vsel %vm1641_vm5, %v287_v37, %v291_v23  ;;  %v239_v49 = vrot.slane %v238_v38, 4  ;;  %v297_v50 = vrot.slane %v296_v39, 4  ;;  %v267_v51 = vrot.slane %v265_v41, 5  ;;  %v225_v61 = vld [vmem:[%s1617_s24 + $0x24] sm:$0xf] }
  0x1e   : > { %335 = vrot.lane.b32.xlu1 %v292_v48, %s1551_s26  ;;  %v249_v52 = vrot.slane %v248_v44, 4  ;;  %v271_v53 = vrot.slane %v269_v46, 4  ;;  %v275_v54 = vshll.u32 %v221_v40, 16  ;;  %v256_v55 = vshrl.u32 %v219_v42, 16  ;;  %v367_v3 = vld [vmem:[%s1617_s24 + $0x1c] sm:$0xf] }
  0x1f   : > { %v244_v57 = vsel %vm1641_vm5, %v239_v49, %v243_v33  ;;  %v302_v58 = vsel %vm1641_vm5, %v297_v50, %v301_v43  ;;  %v259_v59 = vshll.u32 %v219_v42, 16  ;;  %v313_v60 = vshll.u32 %v226_v47, 16  ;;  %v368_v13 = vld [vmem:[%s1617_s24 + $0x20] sm:$0x1]  ;;  %v364_v18 = vld [vmem:[%s1617_s24 + $0x10] sm:$0xf] }
  0x20   : > { %327 = vrot.lane.b32.xlu0 %v244_v57, %s1551_s26  ;;  %v254_v62 = vsel %vm1641_vm5, %v249_v52, %v253_v45  ;;  %v272_v63 = vor.u32 %v271_v53, %v267_v51  ;;  %v277_v1 = vrot.slane %v275_v54, 5  ;;  %v258_v2 = vrot.slane %v256_v55, 4  ;;  %v366_v24 = vld [vmem:[%s1617_s24 + $0x18] sm:$0xe]  ;;  %v365_v30 = vld [vmem:[%s1617_s24 + $0x14] sm:$0x1] }
  0x21   : > { %v261_v4 = vrot.slane %v259_v59, 5  ;;  %v315_v5 = vrot.slane %v313_v60, 5  ;;  %v317_v6 = vshrl.u32 %v226_v47, 16  ;;  %v323_v7 = vshll.u32 %v227_v56, 16  ;;  %v370_v31 = vld [vmem:[%s1617_s24 + $0x28] sm:$0xf] }
  0x22   : > { %337 = vrot.lane.b32.xlu1 %v302_v58, %s1551_s26  ;;  %v273_v8 = vrot.slane %v272_v63, 4  ;;  %v304_v9 = vshrl.u32 %v225_v61, 16  ;;  %v307_v10 = vshll.u32 %v225_v61, 16  ;;  %v403_v14 = vrot.slane %v367_v3, 5  ;;  %v363_v36 = vld [vmem:[%s1617_s24 + $0xc] sm:$0xe] }
  0x23   : > { %v262_v11 = vor.u32 %v261_v4, %v258_v2  ;;  %v319_v12 = vrot.slane %v317_v6, 4  ;;  %v325_v21 = vrot.slane %v323_v7, 5  ;;  %v406_v23 = vrot.slane %v368_v13, 5  ;;  %v371_v41 = vld [vmem:[%s1617_s24 + $0x2c] sm:$0x1] }
  0x24   : > { %329 = vrot.lane.b32.xlu0 %v254_v62, %s1551_s26  ;;  %v278_v15 = vsel %vm1641_vm5, %v273_v8, %v277_v1  ;;  %v306_v16 = vrot.slane %v304_v9, 4  ;;  %v309_v17 = vrot.slane %v307_v10, 5  ;;  %v405_v27 = vrot.slane %v403_v14, 4  ;;  %v369_v44 = vld [vmem:[%s1617_s24 + $0x24] sm:$0xe] }
  0x25   : > { %v263_v19 = vrot.slane %v262_v11, 4  ;;  %v320_v20 = vor.u32 %v319_v12, %v315_v5  ;;  %v396_v28 = vrot.slane %v364_v18, 5  ;;  %v1316_v34 = vrot.slane %v366_v24, 9  ;;  %v1328_v53 = vld [vmem:[%s1617_s24 + $0xc] sm:$0xf] }
  0x26   : > { %333 = vrot.lane.b32.xlu1 %v278_v15, %s1551_s26  ;;  %v310_v22 = vor.u32 %v309_v17, %v306_v16  ;;  %v407_v37 = vsel %vm1619_vm2, %v405_v27, %v406_v23  ;;  %v399_v39 = vrot.slane %v365_v30, 5  ;;  %v410_v40 = vrot.slane %v370_v31, 5  ;;  %v1321_v56 = vld [vmem:[%s1617_s24 + $0x10] sm:$0xf]  ;;  %v1335_v57 = vld [vmem:[%s1617_s24 + $0x28] sm:$0xf] }
  0x27   : > { %v268_v25 = vsel %vm1641_vm5, %v263_v19, %v267_v51  ;;  %v321_v26 = vrot.slane %v320_v20, 4  ;;  %v398_v38 = vrot.slane %v396_v28, 4  ;;  %v404_v42 = vsel %vm1619_vm2, %v1316_v34, %v403_v14  ;;  %v1329_v51 = vld [vmem:[%s1617_s24 + $0x10] sm:$0xf]  ;;  %v1320_v60 = vld [vmem:[%s1617_s24 + $0xc] sm:$0xf] }
  0x28   : > { %331 = vrot.lane.b32.xlu0 %v268_v25, %s1551_s26  ;;  %v311_v29 = vrot.slane %v310_v22, 4  ;;  %v1315_v43 = vrot.slane %v363_v36, 9  ;;  %v412_v46 = vrot.slane %v410_v40, 4  ;;  %v413_v47 = vrot.slane %v371_v41, 5  ;;  %v1334_v61 = vld [vmem:[%s1617_s24 + $0x24] sm:$0xf] }
  0x29   : > { %v326_v33 = vsel %vm1641_vm5, %v321_v26, %v325_v21  ;;  %v400_v45 = vsel %vm1619_vm2, %v398_v38, %v399_v39  ;;  %v1317_v49 = vrot.slane %v369_v44, 9  ;;  %v523_v54 = vshll.u32 %v1329_v51, 16  ;;  %v1325_v3 = vld [vmem:[%s1617_s24 + $0x28] sm:$0xf]  ;;  %v1330_v4 = vld [vmem:[%s1617_s24 + $0x14] sm:$0x1] }
  0x2a   : > { %341 = vrot.lane.b32.xlu1 %v326_v33, %s1551_s26  ;;  %v316_v35 = vsel %vm1641_vm5, %v311_v29, %v315_v5  ;;  %v397_v48 = vsel %vm1619_vm2, %v1315_v43, %v396_v28  ;;  %v414_v50 = vsel %vm1619_vm2, %v412_v46, %v413_v47  ;;  %v527_v55 = vshrl.u32 %v1329_v51, 16  ;;  %v1332_v9 = vld [vmem:[%s1617_s24 + $0x1c] sm:$0xf]  ;;  %v1324_v10 = vld [vmem:[%s1617_s24 + $0x24] sm:$0xf] }
  0x2b   : > { %v411_v52 = vsel %vm1619_vm2, %v1317_v49, %v410_v40  ;;  %v514_v58 = vshrl.u32 %v1328_v53, 16  ;;  %v517_v59 = vshll.u32 %v1328_v53, 16  ;;  %v1708_v62 = vrot.slane %v523_v54, 5  ;;  %v1331_v15 = vld [vmem:[%s1617_s24 + $0x18] sm:$0xf] }
  0x2c   : > { %339 = vrot.lane.b32.xlu0 %v316_v35, %s1551_s26  ;;  %v529_v63 = vrot.slane %v527_v55, 4  ;;  %v571_v1 = vshll.u32 %v1335_v57, 16  ;;  %v575_v2 = vshrl.u32 %v1335_v57, 16  ;;  %v562_v7 = vshrl.u32 %v1334_v61, 16  ;;  %v1323_v16 = vld [vmem:[%s1617_s24 + $0x1c] sm:$0xf] }
  0x2d   : > { %v516_v5 = vrot.slane %v514_v58, 4  ;;  %v519_v6 = vrot.slane %v517_v59, 5  ;;  %v565_v8 = vshll.u32 %v1334_v61, 16  ;;  %v533_v12 = vshll.u32 %v1330_v4, 16  ;;  %v1336_v17 = vld [vmem:[%s1617_s24 + $0x2c] sm:$0x1] }
  0x2e   : > { %425 = vrot.lane.b32.xlu1 %v407_v37, %s1550_s25  ;;  %v530_v11 = vor.u32 %v529_v63, %v1708_v62  ;;  %v1717_v13 = vrot.slane %v571_v1, 5  ;;  %v577_v14 = vrot.slane %v575_v2, 4  ;;  %v547_v18 = vshll.u32 %v1332_v9, 16  ;;  %v1338_v23 = vld [vmem:[%s1617_s24 + $0x34] sm:$0xf] }
  0x2f   : > { %v551_v19 = vshrl.u32 %v1332_v9, 16  ;;  %v520_v20 = vor.u32 %v519_v6, %v516_v5  ;;  %v564_v21 = vrot.slane %v562_v7, 4  ;;  %v567_v22 = vrot.slane %v565_v8, 5  ;;  %v1322_v24 = vld [vmem:[%s1617_s24 + $0x18] sm:$0xf] }
  0x30   : > { %423 = vrot.lane.b32.xlu0 %v404_v42, %s1550_s25  ;;  %v1327_v25 = vld [vmem:[%s1617_s24 + $0x34] sm:$0xf]  ;;  %v538_v26 = vshrl.u32 %v1331_v15, 16  ;;  %v541_v27 = vshll.u32 %v1331_v15, 16  ;;  %v531_v28 = vrot.slane %v530_v11, 4  ;;  %v535_v29 = vrot.slane %v533_v12, 5 }
  0x31   : > { %v578_v30 = vor.u32 %v577_v14, %v1717_v13  ;;  %v581_v31 = vshll.u32 %v1336_v17, 16  ;;  %v1337_v33 = vld [vmem:[%s1617_s24 + $0x30] sm:$0xf]  ;;  %v1333_v34 = vld [vmem:[%s1617_s24 + $0x20] sm:$0x1]  ;;  %v549_v35 = vrot.slane %v547_v18, 5  ;;  %v568_v40 = vor.u32 %v567_v22, %v564_v21 }
  0x32   : > { %421 = vrot.lane.b32.xlu1 %v400_v45, %s1550_s25  ;;  %v553_v36 = vrot.slane %v551_v19, 4  ;;  %v595_v37 = vshll.u32 %v1338_v23, 16  ;;  %v599_v38 = vshrl.u32 %v1338_v23, 16  ;;  %v521_v39 = vrot.slane %v520_v20, 4  ;;  %v1326_v41 = vld [vmem:[%s1617_s24 + $0x30] sm:$0xf] }
  0x33   : > { %v540_v42 = vrot.slane %v538_v26, 4  ;;  %v543_v43 = vrot.slane %v541_v27, 5  ;;  %v586_v44 = vshrl.u32 %v1337_v33, 16  ;;  %v589_v45 = vshll.u32 %v1337_v33, 16  ;;  %v1339_v54 = vld [vmem:[%s1617_s24 + $0x38] sm:$0x1] }
  0x34   : > { %419 = vrot.lane.b32.xlu0 %v397_v48, %s1550_s25  ;;  %v536_v46 = vsel %vm1641_vm5, %v531_v28, %v535_v29  ;;  %v583_v47 = vrot.slane %v581_v31, 5  ;;  %v557_v48 = vshll.u32 %v1333_v34, 16  ;;  %v579_v49 = vrot.slane %v578_v30, 4  ;;  %v1342_v9 = vld [vmem:[%s1617_s24 + $0x14] sm:$0x1] }
  0x35   : > { %v597_v51 = vrot.slane %v595_v37, 5  ;;  %v526_v53 = vsel %vm1641_vm5, %v521_v39, %v1708_v62  ;;  %v569_v55 = vrot.slane %v568_v40, 4  ;;  %v588_v57 = vrot.slane %v586_v44, 4  ;;  %v1341_v62 = vld [vmem:[%s1617_s24 + $0x10] sm:$0xf] }
  0x36   : > { %429 = vrot.lane.b32.xlu1 %v414_v50, %s1550_s25  ;;  %v554_v50 = vor.u32 %v553_v36, %v549_v35  ;;  %v591_v58 = vrot.slane %v589_v45, 5  ;;  %v559_v59 = vrot.slane %v557_v48, 5  ;;  %v605_v1 = vshll.u32 %v1339_v54, 16  ;;  %v1340_v14 = vld [vmem:[%s1617_s24 + $0xc] sm:$0xe] }
  0x37   : > { %v574_v2 = vsel %vm1641_vm5, %v569_v55, %v1717_v13  ;;  %v668_v8 = vrot.slane %v1341_v62, 5  ;;  %v203_v13 = vld [vmem:[%s1617_s24 + $0x18] sm:$0xf]  ;;  %v199_v15 = vld [vmem:[%s1617_s24] sm:$0xf]  ;;  %v671_v18 = vrot.slane %v1342_v9, 5 }
  0x38   : > { %427 = vrot.lane.b32.xlu0 %v411_v52, %s1550_s25  ;;  %v601_v52 = vrot.slane %v599_v38, 4  ;;  %v555_v61 = vrot.slane %v554_v50, 4  ;;  %v592_v4 = vor.u32 %v591_v58, %v588_v57  ;;  %v607_v7 = vrot.slane %v605_v1, 5  ;;  %212 = vst.msk [vmem:[#allocation2 + $0x10] sm:$0xf] %vm207_vm6, %v203_v13 }
  0x39   : > { %v670_v17 = vrot.slane %v668_v8, 4  ;;  %208 = vst.msk [vmem:[#allocation2] sm:$0xf] %vm207_vm6, %v199_v15  ;;  %v1348_v20 = vld [vmem:[%s1617_s24 + $0x2c] sm:$0x1]  ;;  %v1352_v23 = vrot.slane %v1340_v14, 9 }
  0x3a   : > { %470 = vrot.lane.b32.xlu1 %v1321_v56, %s1552_s27  ;;  %v544_v56 = vor.u32 %v543_v43, %v540_v42  ;;  %v602_v63 = vor.u32 %v601_v52, %v597_v51  ;;  %v560_v5 = vsel %vm1641_vm5, %v555_v61, %v559_v59  ;;  %v593_v12 = vrot.slane %v592_v4, 4  ;;  %v1344_v21 = vld [vmem:[%s1617_s24 + $0x1c] sm:$0xf]  ;;  %v1346_v26 = vld [vmem:[%s1617_s24 + $0x24] sm:$0xe] }
  0x3b   : > { %v672_v27 = vsel %vm1619_vm2, %v670_v17, %v671_v18  ;;  %v685_v29 = vrot.slane %v1348_v20, 5  ;;  %v1345_v30 = vld [vmem:[%s1617_s24 + $0x20] sm:$0x1]  ;;  %v675_v31 = vrot.slane %v1344_v21, 5  ;;  %v1350_v33 = vld [vmem:[%s1617_s24 + $0x34] sm:$0xf]  ;;  %v669_v36 = vsel %vm1619_vm2, %v1352_v23, %v668_v8 }
  0x3c   : > { %468 = vrot.lane.b32.xlu0 %v1320_v60, %s1552_s27  ;;  %v584_v60 = vsel %vm1641_vm5, %v579_v49, %v583_v47  ;;  %v603_v6 = vrot.slane %v602_v63, 4  ;;  %v598_v22 = vsel %vm1641_vm5, %v593_v12, %v597_v51  ;;  %v202_v34 = vld [vmem:[%s1617_s24 + $0x10] sm:$0xf]  ;;  %v1354_v37 = vrot.slane %v1346_v26, 9  ;;  %v206_v38 = vld [vmem:[%s1617_s24 + $0x28] sm:$0xf] }
  0x3d   : > { %211 = vst.msk [vmem:[#allocation2 + $0xc] sm:$0xf] %vm207_vm6, %v202_v34  ;;  %v205_v39 = vld [vmem:[%s1617_s24 + $0x24] sm:$0xf]  ;;  %v1343_v40 = vld [vmem:[%s1617_s24 + $0x18] sm:$0xe] }
  0x3e   : > { %478 = vrot.lane.b32.xlu1 %v1325_v3, %s1552_s27  ;;  %v545_v3 = vrot.slane %v544_v56, 4  ;;  %215 = vst.msk [vmem:[#allocation2 + $0x1c] sm:$0xf] %vm207_vm6, %v206_v38  ;;  %214 = vst.msk [vmem:[#allocation2 + $0x18] sm:$0xf] %vm207_vm6, %v205_v39  ;;  %v677_v42 = vrot.slane %v675_v31, 4 }
  0x3f   : > { %v678_v43 = vrot.slane %v1345_v30, 5  ;;  %v689_v44 = vrot.slane %v1350_v33, 5  ;;  %v1351_v45 = vld [vmem:[%s1617_s24 + $0x38] sm:$0x1]  ;;  %v1353_v47 = vrot.slane %v1343_v40, 9 }
  0x40   : > { %476 = vrot.lane.b32.xlu0 %v1324_v10, %s1552_s27  ;;  %v1347_v10 = vld [vmem:[%s1617_s24 + $0x28] sm:$0xf]  ;;  %v550_v11 = vsel %vm1641_vm5, %v545_v3, %v549_v35  ;;  %v201_v35 = vld [vmem:[%s1617_s24 + $0xc] sm:$0xf]  ;;  %v1349_v48 = vld [vmem:[%s1617_s24 + $0x30] sm:$0xe] }
  0x41   : > { %v682_v19 = vrot.slane %v1347_v10, 5  ;;  %210 = vst.msk [vmem:[#allocation2 + $0x8] sm:$0xf] %vm207_vm6, %v201_v35  ;;  %v679_v49 = vsel %vm1619_vm2, %v677_v42, %v678_v43  ;;  %v691_v50 = vrot.slane %v689_v44, 4  ;;  %v692_v51 = vrot.slane %v1351_v45, 5 }
  0x42   : > { %474 = vrot.lane.b32.xlu1 %v1323_v16, %s1552_s27  ;;  %v608_v16 = vsel %vm1641_vm5, %v603_v6, %v607_v7  ;;  %v676_v52 = vsel %vm1619_vm2, %v1353_v47, %v675_v31  ;;  %v1367_v55 = vld [vmem:[%s1617_s24 + $0x1c] sm:$0xf]  ;;  %v1366_v57 = vld [vmem:[%s1617_s24 + $0x18] sm:$0xf]  ;;  %v1373_v61 = vld [vmem:[%s1617_s24 + $0x34] sm:$0xf] }
  0x43   : > { %v684_v28 = vrot.slane %v682_v19, 4  ;;  %v693_v54 = vsel %vm1619_vm2, %v691_v50, %v692_v51  ;;  %v802_v58 = vshll.u32 %v1367_v55, 16  ;;  %v806_v59 = vshrl.u32 %v1367_v55, 16  ;;  %v1358_v62 = vld [vmem:[%s1617_s24 + $0x18] sm:$0xf] }
  0x44   : > { %472 = vrot.lane.b32.xlu0 %v1322_v24, %s1552_s27  ;;  %v204_v24 = vld [vmem:[%s1617_s24 + $0x1c] sm:$0xf]  ;;  %v793_v63 = vshrl.u32 %v1366_v57, 16  ;;  %v796_v1 = vshll.u32 %v1366_v57, 16  ;;  %v854_v6 = vshrl.u32 %v1373_v61, 16 }
  0x45   : > { %213 = vst.msk [vmem:[#allocation2 + $0x14] sm:$0xf] %vm207_vm6, %v204_v24  ;;  %v1820_v3 = vrot.slane %v802_v58, 5  ;;  %v808_v4 = vrot.slane %v806_v59, 4  ;;  %v1363_v7 = vld [vmem:[%s1617_s24 + $0x34] sm:$0xf] }
  0x46   : > { %482 = vrot.lane.b32.xlu1 %v1327_v25, %s1552_s27  ;;  %v200_v25 = vld [vmem:[%s1617_s24 + $0x4] sm:$0xf]  ;;  %v1368_v8 = vld [vmem:[%s1617_s24 + $0x20] sm:$0x1]  ;;  %v795_v9 = vrot.slane %v793_v63, 4  ;;  %v798_v10 = vrot.slane %v796_v1, 5 }
  0x47   : > { %209 = vst.msk [vmem:[#allocation2 + $0x4] sm:$0xf] %vm207_vm6, %v200_v25  ;;  %v1370_v13 = vld [vmem:[%s1617_s24 + $0x28] sm:$0xf]  ;;  %v1362_v14 = vld [vmem:[%s1617_s24 + $0x30] sm:$0xf]  ;;  %v809_v15 = vor.u32 %v808_v4, %v1820_v3 }
  0x48   : > { %480 = vrot.lane.b32.xlu0 %v1326_v41, %s1552_s27  ;;  %v686_v41 = vsel %vm1619_vm2, %v684_v28, %v685_v29  ;;  %v856_v18 = vrot.slane %v854_v6, 4  ;;  %v1361_v20 = vld [vmem:[%s1617_s24 + $0x28] sm:$0xf]  ;;  %v1374_v21 = vld [vmem:[%s1617_s24 + $0x38] sm:$0x1]  ;;  %v830_v23 = vshrl.u32 %v1370_v13, 16  ;;  %v799_v24 = vor.u32 %v798_v10, %v795_v9 }
  0x49   : > { %v1360_v28 = vld [vmem:[%s1617_s24 + $0x24] sm:$0xf]  ;;  %v1365_v29 = vld [vmem:[%s1617_s24 + $0x40] sm:$0xf]  ;;  %v810_v33 = vrot.slane %v809_v15, 4 }
  0x4a   : > { %611 = vrot.lane.b32.xlu1 %v536_v46, %s1553_s28  ;;  %v683_v46 = vsel %vm1619_vm2, %v1354_v37, %v682_v19  ;;  %v1369_v19 = vld [vmem:[%s1617_s24 + $0x24] sm:$0xf]  ;;  %v1375_v37 = vld [vmem:[%s1617_s24 + $0x3c] sm:$0xf]  ;;  %v1371_v38 = vld [vmem:[%s1617_s24 + $0x2c] sm:$0x1] }
  0x4b   : > { %v817_v30 = vshrl.u32 %v1369_v19, 16  ;;  %v820_v31 = vshll.u32 %v1369_v19, 16  ;;  %v832_v40 = vrot.slane %v830_v23, 4  ;;  %v800_v43 = vrot.slane %v799_v24, 4  ;;  %v1364_v45 = vld [vmem:[%s1617_s24 + $0x3c] sm:$0xf] }
  0x4c   : > { %609 = vrot.lane.b32.xlu0 %v526_v53, %s1553_s28  ;;  %v1355_v53 = vrot.slane %v1349_v48, 9  ;;  %v865_v48 = vshrl.u32 %v1375_v37, 16  ;;  %v1377_v58 = vld [vmem:[%s1617_s24 + $0x44] sm:$0x1]  ;;  %v1386_v23 = vld [vmem:[%s1617_s24 + $0x38] sm:$0x1] }
  0x4d   : > { %v822_v47 = vrot.slane %v820_v31, 5  ;;  %v805_v57 = vsel %vm1641_vm5, %v800_v43, %v1820_v3  ;;  %v1379_v3 = vld [vmem:[%s1617_s24 + $0x1c] sm:$0xf]  ;;  %v1503_v19 = vld [vmem:[%s2024_s1 + $0x10] ss:$0 sps:$4 sm:$0x33]  }
  0x4e   : > { %619 = vrot.lane.b32.xlu1 %v584_v60, %s1553_s28  ;;  %v690_v56 = vsel %vm1619_vm2, %v1355_v53, %v689_v44  ;;  %v1359_v60 = vld [vmem:[%s1617_s24 + $0x1c] sm:$0xf]  ;;  %v1382_v24 = vld [vmem:[%s1617_s24 + $0x28] sm:$0xf]  ;;  %1452 = vmatprep.subr.msk.bf16.mxu0 %vm1074_vm7, %v1503_v19  ;;  %v1383_v32 = vld [vmem:[%s1617_s24 + $0x2c] sm:$0x1] }
  0x4f   : > { %1453 = vmatprep.subr.msk.bf16.mxu1 %vm1074_vm7, %v1503_v19  ;;  %v957_v43 = vrot.slane %v1383_v32, 5 }
  0x50   : > { %617 = vrot.lane.b32.xlu0 %v574_v2, %s1553_s28  ;;  %v1372_v2 = vld [vmem:[%s1617_s24 + $0x30] sm:$0xf] }
  0x51   : > { %v844_v12 = vshll.u32 %v1372_v2, 16 }
  0x52   : > { %615 = vrot.lane.b32.xlu1 %v560_v5, %s1553_s28  ;;  %v850_v5 = vshll.u32 %v1373_v61, 16  ;;  %v867_v61 = vrot.slane %v865_v48, 4 }
  0x53   : > { %v846_v26 = vrot.slane %v844_v12, 5  ;;  %v1380_v12 = vld [vmem:[%s1617_s24 + $0x20] sm:$0x1] }
  0x54   : > { %613 = vrot.lane.b32.xlu0 %v550_v11, %s1553_s28  ;;  %v841_v11 = vshrl.u32 %v1372_v2, 16  ;;  %v1829_v17 = vrot.slane %v850_v5, 5  ;;  %v884_v5 = vshll.u32 %v1377_v58, 16 }
  0x56   : > { %623 = vrot.lane.b32.xlu1 %v608_v16, %s1553_s28  ;;  %v812_v16 = vshll.u32 %v1368_v8, 16  ;;  %v843_v25 = vrot.slane %v841_v11, 4  ;;  %v857_v35 = vor.u32 %v856_v18, %v1829_v17  ;;  %v886_v11 = vrot.slane %v884_v5, 5  ;;  %v1378_v18 = vld [vmem:[%s1617_s24 + $0x18] sm:$0xe] }
  0x58   : > { %621 = vrot.lane.b32.xlu0 %v598_v22, %s1553_s28  ;;  %v826_v22 = vshll.u32 %v1370_v13, 16  ;;  %v814_v34 = vrot.slane %v812_v16, 5  ;;  %v847_v44 = vor.u32 %v846_v26, %v843_v25  ;;  %v858_v53 = vrot.slane %v857_v35, 4  ;;  %v1388_v35 = vld [vmem:[%s1617_s24 + $0x40] sm:$0xf] }
  0x59   : > { %v947_v13 = vrot.slane %v1379_v3, 5  ;;  %v1076_v25 = vsel %vm1074_vm7, %v1503_v19, 0 }
  0x5a   : > { %696 = vrot.lane.b32.xlu1 %v672_v27, %s1554_s29  ;;  %v1376_v27 = vld [vmem:[%s1617_s24 + $0x40] sm:$0xf]  ;;  %v828_v39 = vrot.slane %v826_v22, 5  ;;  %v815_v50 = vsel %vm1641_vm5, %v810_v33, %v814_v34  ;;  %v848_v59 = vrot.slane %v847_v44, 4  ;;  %1433 = vmatpush3.bf16.msra.mxu0 %v1076_v25  ;;  %v964_v33 = vrot.slane %v1386_v23, 5 }
  0x5b   : > { %v878_v42 = vshrl.u32 %v1376_v27, 16  ;;  %1449 = vmatpush3.bf16.msra.mxu1 %v1076_v25  ;;  %v954_v34 = vrot.slane %v1382_v24, 5  ;;  %v968_v44 = vrot.slane %v1388_v35, 5 }
  0x5c   : > { %694 = vrot.lane.b32.xlu0 %v669_v36, %s1554_s29  ;;  %v860_v36 = vshll.u32 %v1374_v21, 16  ;;  %v853_v6 = vsel %vm1641_vm5, %v848_v59, %v1829_v17  ;;  %v950_v17 = vrot.slane %v1380_v12, 5  ;;  %v949_v21 = vrot.slane %v947_v13, 4 }
  0x5e   : > { %704 = vrot.lane.b32.xlu1 %v686_v41, %s1554_s29  ;;  %v874_v41 = vshll.u32 %v1376_v27, 16  ;;  %v862_v51 = vrot.slane %v860_v36, 5  ;;  %v1390_v27 = vrot.slane %v1378_v18, 9 }
  0x60   : > { %702 = vrot.lane.b32.xlu0 %v683_v46, %s1554_s29  ;;  %v819_v46 = vrot.slane %v817_v30, 4  ;;  %v876_v55 = vrot.slane %v874_v41, 5  ;;  %v951_v30 = vsel %vm1619_vm2, %v949_v21, %v950_v17  ;;  %v948_v36 = vsel %vm1619_vm2, %v1390_v27, %v947_v13 }
  0x62   : > { %700 = vrot.lane.b32.xlu1 %v679_v49, %s1554_s29  ;;  %v868_v49 = vshll.u32 %v1375_v37, 16 }
  0x64   : > { %698 = vrot.lane.b32.xlu0 %v676_v52, %s1554_s29  ;;  %v836_v52 = vshll.u32 %v1371_v38, 16  ;;  %v870_v63 = vrot.slane %v868_v49, 5  ;;  %v1381_v38 = vld [vmem:[%s1617_s24 + $0x24] sm:$0xe]  ;;  %v1387_v49 = vld [vmem:[%s1617_s24 + $0x3c] sm:$0xe] }
  0x65   : > { %v1391_v48 = vrot.slane %v1381_v38, 9 }
  0x66   : > { %708 = vrot.lane.b32.xlu1 %v693_v54, %s1554_s29  ;;  %v833_v54 = vor.u32 %v832_v40, %v828_v39  ;;  %v838_v1 = vrot.slane %v836_v52, 5  ;;  %v871_v8 = vor.u32 %v870_v63, %v867_v61 }
  0x68   : > { %706 = vrot.lane.b32.xlu0 %v690_v56, %s1554_s29  ;;  %v880_v56 = vrot.slane %v878_v42, 4  ;;  %v834_v2 = vrot.slane %v833_v54, 4  ;;  %v872_v16 = vrot.slane %v871_v8, 4  ;;  %v956_v42 = vrot.slane %v954_v34, 4 }
  0x69   : > { %v955_v54 = vsel %vm1619_vm2, %v1391_v48, %v954_v34 }
  0x6a   : > { %749 = vrot.lane.b32.xlu1 %v1359_v60, %s1555_s30  ;;  %v823_v60 = vor.u32 %v822_v47, %v819_v46  ;;  %v881_v4 = vor.u32 %v880_v56, %v876_v55  ;;  %v839_v9 = vsel %vm1641_vm5, %v834_v2, %v838_v1  ;;  %v877_v26 = vsel %vm1641_vm5, %v872_v16, %v876_v55  ;;  %v1389_v46 = vld [vmem:[%s1617_s24 + $0x44] sm:$0x1] }
  0x6b   : > { %v971_v52 = vrot.slane %v1389_v46, 5  ;;  %v1393_v55 = vrot.slane %v1387_v49, 9 }
  0x6c   : > { %747 = vrot.lane.b32.xlu0 %v1358_v62, %s1555_s30  ;;  %v863_v62 = vsel %vm1641_vm5, %v858_v53, %v862_v51  ;;  %v882_v10 = vrot.slane %v881_v4, 4  ;;  %v970_v51 = vrot.slane %v968_v44, 4 }
  0x6d   : > { %v969_v59 = vsel %vm1619_vm2, %v1393_v55, %v968_v44 }
  0x6e   : > { %757 = vrot.lane.b32.xlu1 %v1363_v7, %s1555_s30  ;;  %v824_v7 = vrot.slane %v823_v60, 4 }
  0x70   : > { %755 = vrot.lane.b32.xlu0 %v1362_v14, %s1555_s30  ;;  %v1385_v14 = vld [vmem:[%s1617_s24 + $0x34] sm:$0xf]  ;;  %v829_v15 = vsel %vm1641_vm5, %v824_v7, %v828_v39  ;;  %v1506_v39 = vld [vmem:[%s2024_s1] sm:$0xff]  }
  0x71   : > { %v961_v22 = vrot.slane %v1385_v14, 5 }
  0x72   : > { %753 = vrot.lane.b32.xlu1 %v1361_v20, %s1555_s30  ;;  %v887_v20 = vsel %vm1641_vm5, %v882_v10, %v886_v11 }
  0x73   : > { %v963_v31 = vrot.slane %v961_v22, 4 }
  0x74   : > { %751 = vrot.lane.b32.xlu0 %v1360_v28, %s1555_s30  ;;  %v1384_v28 = vld [vmem:[%s1617_s24 + $0x30] sm:$0xe]  ;;  %s1310_s24 = sshll.u32 %s190_s23, 2 }
  0x75   : > { %v1392_v37 = vrot.slane %v1384_v28, 9  ;;  %v965_v41 = vsel %vm1619_vm2, %v963_v31, %v964_v33  ;;  %s1990_s26 = scalar_lea.vmem %s2026_s3, %s1310_s24 }
  0x76   : > { %761 = vrot.lane.b32.xlu1 %v1365_v29, %s1555_s30  ;;  %v1504_v29 = vld [vmem:[%s2024_s1 + $0x8] sm:$0xff]  }
  0x77   : > { %1434 = vmatprep.subr.bf16.mxu0 %v1504_v29  ;;  %1447 = vmatprep.subr.bf16.mxu1 %v1504_v29  ;;  %v962_v47 = vsel %vm1619_vm2, %v1392_v37, %v961_v22 }
  0x78   : > { %759 = vrot.lane.b32.xlu0 %v1364_v45, %s1555_s30  ;;  %1435 = vmatpush3.bf16.msra.mxu0 %v1504_v29 }
  0x79   : > { %1450 = vmatpush3.bf16.msra.mxu1 %v1504_v29  ;;  %1436 = vmatprep.subr.bf16.mxu0 %v1506_v39 }
  0x7a   : > { %890 = vrot.lane.b32.xlu1 %v815_v50, %s1556_s4  ;;  %1448 = vmatprep.subr.bf16.mxu1 %v1506_v39  ;;  %v958_v50 = vsel %vm1619_vm2, %v956_v42, %v957_v43 }
  0x7c   : > { %888 = vrot.lane.b32.xlu0 %v805_v57, %s1556_s4  ;;  %1437 = vmatpush3.bf16.msra.mxu0 %v1506_v39  ;;  %v972_v57 = vsel %vm1619_vm2, %v970_v51, %v971_v52  ;;  %vm1199_vm2 = vcmask 60416  }
  0x7d   : > { %1451 = vmatpush3.bf16.msra.mxu1 %v1506_v39 }
  0x7e   : > { %898 = vrot.lane.b32.xlu1 %v863_v62, %s1556_s4 }
  0x80   : > { %896 = vrot.lane.b32.xlu0 %v853_v6, %s1556_s4 }
  0x82   : > { %894 = vrot.lane.b32.xlu1 %v839_v9, %s1556_s4 }
  0x84   : > { %892 = vrot.lane.b32.xlu0 %v829_v15, %s1556_s4 }
  0x86   : > { %902 = vrot.lane.b32.xlu1 %v887_v20, %s1556_s4 }
  0x88   : > { %900 = vrot.lane.b32.xlu0 %v877_v26, %s1556_s4 }
  0x89   : > { %v416_v45 = vpop.permute.xlu0 %415 }
  0x8a   : > { %975 = vrot.lane.b32.xlu1 %v951_v30, %s1557_s9 }
  0x8b   : > { %v418_v40 = vpop.permute.xlu1 %417 }
  0x8c   : > { %973 = vrot.lane.b32.xlu0 %v948_v36, %s1557_s9 }
  0x8e   : > { %983 = vrot.lane.b32.xlu1 %v965_v41, %s1557_s9 }
  0x90   : > { %981 = vrot.lane.b32.xlu0 %v962_v47, %s1557_s9  ;;  %v336_v53 = vpop.permute.xlu1 %335 }
  0x91   : > { %356 = vst.msk [vmem:[#allocation2 + $0x10] sm:$0xf] %vm351_vm8, %v336_v53 }
  0x92   : > { %v328_v56 = vpop.permute.xlu0 %327  ;;  %979 = vrot.lane.b32.xlu1 %v958_v50, %s1557_s9 }
  0x93   : > { %352 = vst.msk [vmem:[#allocation2] sm:$0xf] %vm351_vm8, %v328_v56 }
  0x94   : > { %977 = vrot.lane.b32.xlu0 %v955_v54, %s1557_s9  ;;  %v338_v58 = vpop.permute.xlu1 %337  ;;  %440 = vst.msk [vmem:[#allocation2] sm:$0xf] %vm439_vm9, %v416_v45 }
  0x95   : > { %357 = vst.msk [vmem:[#allocation2 + $0x14] sm:$0xf] %vm351_vm8, %v338_v58 }
  0x96   : > { %v330_v60 = vpop.permute.xlu0 %329  ;;  %987 = vrot.lane.b32.xlu1 %v972_v57, %s1557_s9 }
  0x97   : > { %353 = vst.msk [vmem:[#allocation2 + $0x4] sm:$0xf] %vm351_vm8, %v330_v60 }
  0x98   : > { %985 = vrot.lane.b32.xlu0 %v969_v59, %s1557_s9  ;;  %v334_v61 = vpop.permute.xlu1 %333  ;;  %441 = vst.msk [vmem:[#allocation2 + $0x4] sm:$0xf] %vm439_vm9, %v418_v40  ;;  %v1394_v59 = vld [vmem:[%s2025_s2] ss:$0 sm:$0xff] }
  0x99   : > { %355 = vst.msk [vmem:[#allocation2 + $0xc] sm:$0xf] %vm351_vm8, %v334_v61 }
  0x9a   : > { %v332_v63 = vpop.permute.xlu0 %331 }
  0x9b   : > { %354 = vst.msk [vmem:[#allocation2 + $0x8] sm:$0xf] %vm351_vm8, %v332_v63 }
  0x9c   : > { %v342_v1 = vpop.permute.xlu1 %341 }
  0x9d   : > { %359 = vst.msk [vmem:[#allocation2 + $0x1c] sm:$0xf] %vm351_vm8, %v342_v1 }
  0x9e   : > { %v340_v0 = vpop.permute.xlu0 %339 }
  0x9f   : > { %358 = vst.msk [vmem:[#allocation2 + $0x18] sm:$0xf] %vm351_vm8, %v340_v0 }
  0xa0   : > { %v426_v62 = vpop.permute.xlu1 %425 }
  0xa1   : > { %445 = vst.msk [vmem:[#allocation2 + $0x14] sm:$0xf] %vm439_vm9, %v426_v62 }
  0xa2   : > { %v424_v2 = vpop.permute.xlu0 %423 }
  0xa3   : > { %444 = vst.msk [vmem:[#allocation2 + $0x10] sm:$0xf] %vm439_vm9, %v424_v2 }
  0xa4   : > { %v422_v4 = vpop.permute.xlu1 %421 }
  0xa5   : > { %443 = vst.msk [vmem:[#allocation2 + $0xc] sm:$0xf] %vm439_vm9, %v422_v4 }
  0xa6   : > { %v420_v5 = vpop.permute.xlu0 %419 }
  0xa7   : > { %442 = vst.msk [vmem:[#allocation2 + $0x8] sm:$0xf] %vm439_vm9, %v420_v5 }
  0xa8   : > { %v430_v3 = vpop.permute.xlu1 %429 }
  0xa9   : > { %447 = vst.msk [vmem:[#allocation2 + $0x1c] sm:$0xf] %vm439_vm9, %v430_v3 }
  0xaa   : > { %v428_v6 = vpop.permute.xlu0 %427 }
  0xab   : > { %446 = vst.msk [vmem:[#allocation2 + $0x18] sm:$0xf] %vm439_vm9, %v428_v6 }
  0xac   : > { %v471_v7 = vpop.permute.xlu1 %470 }
  0xad   : > { %494 = vst.msk [vmem:[#allocation2 + $0x4] sm:$0xf] %vm492_vm10, %v471_v7 }
  0xae   : > { %v469_v8 = vpop.permute.xlu0 %468 }
  0xaf   : > { %493 = vst.msk [vmem:[#allocation2] sm:$0xf] %vm492_vm10, %v469_v8 }
  0xb0   : > { %v479_v9 = vpop.permute.xlu1 %478 }
  0xb1   : > { %498 = vst.msk [vmem:[#allocation2 + $0x14] sm:$0xf] %vm492_vm10, %v479_v9 }
  0xb2   : > { %v477_v10 = vpop.permute.xlu0 %476 }
  0xb3   : > { %497 = vst.msk [vmem:[#allocation2 + $0x10] sm:$0xf] %vm492_vm10, %v477_v10 }
  0xb4   : > { %v475_v11 = vpop.permute.xlu1 %474 }
  0xb5   : > { %496 = vst.msk [vmem:[#allocation2 + $0xc] sm:$0xf] %vm492_vm10, %v475_v11 }
  0xb6   : > { %v473_v12 = vpop.permute.xlu0 %472 }
  0xb7   : > { %495 = vst.msk [vmem:[#allocation2 + $0x8] sm:$0xf] %vm492_vm10, %v473_v12 }
  0xb8   : > { %v483_v13 = vpop.permute.xlu1 %482 }
  0xb9   : > { %500 = vst.msk [vmem:[#allocation2 + $0x1c] sm:$0xf] %vm492_vm10, %v483_v13 }
  0xba   : > { %v481_v14 = vpop.permute.xlu0 %480 }
  0xbb   : > { %499 = vst.msk [vmem:[#allocation2 + $0x18] sm:$0xf] %vm492_vm10, %v481_v14 }
  0xbc   : > { %v612_v15 = vpop.permute.xlu1 %611 }
  0xbd   : > { %635 = vst.msk [vmem:[#allocation2 + $0x4] sm:$0xf] %vm633_vm11, %v612_v15 }
  0xbe   : > { %v610_v16 = vpop.permute.xlu0 %609 }
  0xbf   : > { %634 = vst.msk [vmem:[#allocation2] sm:$0xf] %vm633_vm11, %v610_v16 }
  0xc0   : > { %v620_v17 = vpop.permute.xlu1 %619 }
  0xc1   : > { %639 = vst.msk [vmem:[#allocation2 + $0x14] sm:$0xf] %vm633_vm11, %v620_v17 }
  0xc2   : > { %v618_v18 = vpop.permute.xlu0 %617 }
  0xc3   : > { %638 = vst.msk [vmem:[#allocation2 + $0x10] sm:$0xf] %vm633_vm11, %v618_v18 }
  0xc4   : > { %v616_v19 = vpop.permute.xlu1 %615 }
  0xc5   : > { %637 = vst.msk [vmem:[#allocation2 + $0xc] sm:$0xf] %vm633_vm11, %v616_v19 }
  0xc6   : > { %v614_v20 = vpop.permute.xlu0 %613 }
  0xc7   : > { %636 = vst.msk [vmem:[#allocation2 + $0x8] sm:$0xf] %vm633_vm11, %v614_v20 }
  0xc8   : > { %v624_v21 = vpop.permute.xlu1 %623 }
  0xc9   : > { %641 = vst.msk [vmem:[#allocation2 + $0x1c] sm:$0xf] %vm633_vm11, %v624_v21 }
  0xca   : > { %v622_v22 = vpop.permute.xlu0 %621 }
  0xcb   : > { %640 = vst.msk [vmem:[#allocation2 + $0x18] sm:$0xf] %vm633_vm11, %v622_v22 }
  0xcc   : > { %v697_v23 = vpop.permute.xlu1 %696 }
  0xcd   : > { %720 = vst.msk [vmem:[#allocation2 + $0x4] sm:$0xf] %vm718_vm12, %v697_v23 }
  0xce   : > { %v695_v24 = vpop.permute.xlu0 %694 }
  0xcf   : > { %719 = vst.msk [vmem:[#allocation2] sm:$0xf] %vm718_vm12, %v695_v24 }
  0xd0   : > { %v705_v25 = vpop.permute.xlu1 %704 }
  0xd1   : > { %724 = vst.msk [vmem:[#allocation2 + $0x14] sm:$0xf] %vm718_vm12, %v705_v25 }
  0xd2   : > { %v703_v26 = vpop.permute.xlu0 %702 }
  0xd3   : > { %723 = vst.msk [vmem:[#allocation2 + $0x10] sm:$0xf] %vm718_vm12, %v703_v26 }
  0xd4   : > { %v701_v27 = vpop.permute.xlu1 %700 }
  0xd5   : > { %722 = vst.msk [vmem:[#allocation2 + $0xc] sm:$0xf] %vm718_vm12, %v701_v27 }
  0xd6   : > { %v699_v28 = vpop.permute.xlu0 %698 }
  0xd7   : > { %721 = vst.msk [vmem:[#allocation2 + $0x8] sm:$0xf] %vm718_vm12, %v699_v28 }
  0xd8   : > { %v709_v29 = vpop.permute.xlu1 %708 }
  0xd9   : > { %726 = vst.msk [vmem:[#allocation2 + $0x1c] sm:$0xf] %vm718_vm12, %v709_v29 }
  0xda   : > { %v707_v30 = vpop.permute.xlu0 %706 }
  0xdb   : > { %725 = vst.msk [vmem:[#allocation2 + $0x18] sm:$0xf] %vm718_vm12, %v707_v30 }
  0xdc   : > { %v750_v31 = vpop.permute.xlu1 %749 }
  0xdd   : > { %773 = vst.msk [vmem:[#allocation2 + $0x4] sm:$0xf] %vm771_vm13, %v750_v31 }
  0xde   : > { %v748_v33 = vpop.permute.xlu0 %747 }
  0xdf   : > { %772 = vst.msk [vmem:[#allocation2] sm:$0xf] %vm771_vm13, %v748_v33 }
  0xe0   : > { %v758_v34 = vpop.permute.xlu1 %757 }
  0xe1   : > { %777 = vst.msk [vmem:[#allocation2 + $0x14] sm:$0xf] %vm771_vm13, %v758_v34 }
  0xe2   : > { %v756_v32 = vpop.permute.xlu0 %755 }
  0xe3   : > { %776 = vst.msk [vmem:[#allocation2 + $0x10] sm:$0xf] %vm771_vm13, %v756_v32 }
  0xe4   : > { %v754_v35 = vpop.permute.xlu1 %753 }
  0xe5   : > { %775 = vst.msk [vmem:[#allocation2 + $0xc] sm:$0xf] %vm771_vm13, %v754_v35 }
  0xe6   : > { %v752_v36 = vpop.permute.xlu0 %751 }
  0xe7   : > { %774 = vst.msk [vmem:[#allocation2 + $0x8] sm:$0xf] %vm771_vm13, %v752_v36 }
  0xe8   : > { %v762_v37 = vpop.permute.xlu1 %761 }
  0xe9   : > { %779 = vst.msk [vmem:[#allocation2 + $0x1c] sm:$0xf] %vm771_vm13, %v762_v37 }
  0xea   : > { %v760_v38 = vpop.permute.xlu0 %759 }
  0xeb   : > { %778 = vst.msk [vmem:[#allocation2 + $0x18] sm:$0xf] %vm771_vm13, %v760_v38 }
  0xec   : > { %v891_v39 = vpop.permute.xlu1 %890 }
  0xed   : > { %914 = vst.msk [vmem:[#allocation2 + $0x4] sm:$0xf] %vm912_vm14, %v891_v39 }
  0xee   : > { %v889_v40 = vpop.permute.xlu0 %888 }
  0xef   : > { %913 = vst.msk [vmem:[#allocation2] sm:$0xf] %vm912_vm14, %v889_v40 }
  0xf0   : > { %v899_v41 = vpop.permute.xlu1 %898 }
  0xf1   : > { %918 = vst.msk [vmem:[#allocation2 + $0x14] sm:$0xf] %vm912_vm14, %v899_v41 }
  0xf2   : > { %v897_v42 = vpop.permute.xlu0 %896 }
  0xf3   : > { %917 = vst.msk [vmem:[#allocation2 + $0x10] sm:$0xf] %vm912_vm14, %v897_v42 }
  0xf4   : > { %v895_v43 = vpop.permute.xlu1 %894 }
  0xf5   : > { %916 = vst.msk [vmem:[#allocation2 + $0xc] sm:$0xf] %vm912_vm14, %v895_v43 }
  0xf6   : > { %v893_v44 = vpop.permute.xlu0 %892 }
  0xf7   : > { %915 = vst.msk [vmem:[#allocation2 + $0x8] sm:$0xf] %vm912_vm14, %v893_v44 }
  0xf8   : > { %v903_v45 = vpop.permute.xlu1 %902 }
  0xf9   : > { %920 = vst.msk [vmem:[#allocation2 + $0x1c] sm:$0xf] %vm912_vm14, %v903_v45 }
  0xfa   : > { %v901_v46 = vpop.permute.xlu0 %900 }
  0xfb   : > { %919 = vst.msk [vmem:[#allocation2 + $0x18] sm:$0xf] %vm912_vm14, %v901_v46 }
  0xfc   : > { %v976_v47 = vpop.permute.xlu1 %975 }
  0xfd   : > { %999 = vst.msk [vmem:[#allocation2 + $0x4] sm:$0xf] %vm997_vm15, %v976_v47 }
  0xfe   : > { %v974_v48 = vpop.permute.xlu0 %973 }
  0xff   : > { %998 = vst.msk [vmem:[#allocation2] sm:$0xf] %vm997_vm15, %v974_v48 }
 0x100   : > { %v984_v49 = vpop.permute.xlu1 %983 }
 0x101   : > { %1003 = vst.msk [vmem:[#allocation2 + $0x14] sm:$0xf] %vm997_vm15, %v984_v49 }
 0x102   : > { %v982_v50 = vpop.permute.xlu0 %981 }
 0x103   : > { %1002 = vst.msk [vmem:[#allocation2 + $0x10] sm:$0xf] %vm997_vm15, %v982_v50 }
 0x104   : > { %v980_v51 = vpop.permute.xlu1 %979 }
 0x105   : > { %1001 = vst.msk [vmem:[#allocation2 + $0xc] sm:$0xf] %vm997_vm15, %v980_v51 }
 0x106   : > { %v978_v52 = vpop.permute.xlu0 %977  ;;  %v1505_v53 = vld [vmem:[#allocation2] sm:$0xff]  }
 0x107   : > { %1000 = vst.msk [vmem:[#allocation2 + $0x8] sm:$0xf] %vm997_vm15, %v978_v52  ;;  %1438 = vmatprep.mubr.msk.bf16.mxu0 %vm1061_vm0, %v1505_v53 }
 0x108   : > { %v988_v54 = vpop.permute.xlu1 %987 }
 0x109   : > { %1005 = vst.msk [vmem:[#allocation2 + $0x1c] sm:$0xf] %vm997_vm15, %v988_v54 }
 0x10a   : > { %v986_v55 = vpop.permute.xlu0 %985  ;;  %v1507_v56 = vld [vmem:[#allocation2 + $0x10] sm:$0xff]  }
 0x10b   : > { %1004 = vst.msk [vmem:[#allocation2 + $0x18] sm:$0xf] %vm997_vm15, %v986_v55  ;;  %1442 = vmatprep.mubr.msk.bf16.mxu1 %vm1061_vm0, %v1507_v56 }
 0x10e   : > { %v1508_v57 = vld [vmem:[#allocation2 + $0x8] sm:$0xff]  }
 0x10f   : > { %1439 = vmatmul.mubr.msk.bf16.vlgmr.msra.gmra.mxu0 %vm1061_vm0, %v1508_v57 }
 0x112   : > { %v1509_v58 = vld [vmem:[#allocation2 + $0x18] sm:$0xff]  }
 0x113   : > { %1443 = vmatmul.mubr.msk.bf16.vlgmr.msra.gmra.mxu1 %vm1061_vm0, %v1509_v58 }
 0x1cf   : > { %v1440_v60 = vpop.f32.mrf.mxu0 }
 0x1d0   : > { %v1121_v61 = vadd.f32 %v1440_v60, %v1394_v59 }
 0x1d1   : > { %v1112_v63 = vpop.f32.mrf.mxu0 }
 0x1d2   : > { %vm1145_vm1 = vcmp.gt.f32.partialorder %v1121_v61, 0.0  ;;  %v1153_v1 = vmul.f32 0.1, %v1121_v61  ;;  %v1113_v0 = vadd.f32 %v1394_v59, %v1112_v63 }
 0x1d3   : > { %v1441_v62 = vpop.f32.mrf.mxu0  ;;  %v1444_v2 = vpop.f32.mrf.mxu1 }
 0x1d4   : > { %v1161_v4 = vsel %vm1145_vm1, %v1121_v61, %v1153_v1  ;;  %vm1143_vm3 = vcmp.gt.f32.partialorder %v1113_v0, 0.0  ;;  %v1151_v5 = vmul.f32 0.1, %v1113_v0  ;;  %v1124_v3 = vadd.f32 %v1441_v62, %v1394_v59 }
 0x1d5   : > { %v1419_v6 = vpack.c.bf16 %v1161_v4, %v1161_v4  ;;  %v1137_v7 = vadd.f32 %v1444_v2, %v1394_v59  ;;  %v1115_v8 = vpop.f32.mrf.mxu0  ;;  %v1128_v9 = vpop.f32.mrf.mxu1 }
 0x1d6   : > { %v1159_v10 = vsel %vm1143_vm3, %v1113_v0, %v1151_v5  ;;  %vm1146_vm4 = vcmp.gt.f32.partialorder %v1124_v3, 0.0  ;;  %v1154_v11 = vmul.f32 0.1, %v1124_v3  ;;  %v1116_v12 = vadd.f32 %v1394_v59, %v1115_v8 }
 0x1d7   : > { %1202 = vst.msk [vmem:[%s1990_s26 + $0x8] sm:$0xf] %vm1199_vm2, %v1419_v6  ;;  %v1417_v13 = vpack.c.bf16 %v1159_v10, %v1159_v10  ;;  %vm1149_vm5 = vcmp.gt.f32.partialorder %v1137_v7, 0.0  ;;  %v1157_v14 = vmul.f32 0.1, %v1137_v7  ;;  %v1129_v15 = vadd.f32 %v1394_v59, %v1128_v9  ;;  %v1445_v16 = vpop.f32.mrf.mxu1 }
 0x1d8   : > { %v1162_v17 = vsel %vm1146_vm4, %v1124_v3, %v1154_v11  ;;  %vm1144_vm6 = vcmp.gt.f32.partialorder %v1116_v12, 0.0  ;;  %v1152_v18 = vmul.f32 0.1, %v1116_v12  ;;  %v1140_v19 = vadd.f32 %v1445_v16, %v1394_v59 }
 0x1d9   : > { %1200 = vst.msk [vmem:[%s1990_s26] sm:$0xf] %vm1199_vm2, %v1417_v13  ;;  %v1420_v20 = vpack.c.bf16 %v1162_v17, %v1162_v17  ;;  %v1165_v21 = vsel %vm1149_vm5, %v1137_v7, %v1157_v14  ;;  %vm1147_vm7 = vcmp.gt.f32.partialorder %v1129_v15, 0.0  ;;  %v1155_v22 = vmul.f32 0.1, %v1129_v15  ;;  %v1131_v23 = vpop.f32.mrf.mxu1 }
 0x1da   : > { %v1423_v24 = vpack.c.bf16 %v1165_v21, %v1165_v21  ;;  %v1160_v25 = vsel %vm1144_vm6, %v1116_v12, %v1152_v18  ;;  %vm1150_vm8 = vcmp.gt.f32.partialorder %v1140_v19, 0.0  ;;  %v1158_v26 = vmul.f32 0.1, %v1140_v19 }
 0x1db   : > { %1203 = vst.msk [vmem:[%s1990_s26 + $0xc] sm:$0xf] %vm1199_vm2, %v1420_v20  ;;  %v1418_v27 = vpack.c.bf16 %v1160_v25, %v1160_v25  ;;  %v1163_v28 = vsel %vm1147_vm7, %v1129_v15, %v1155_v22  ;;  %v1132_v29 = vadd.f32 %v1394_v59, %v1131_v23 }
 0x1dc   : > { %1206 = vst.msk [vmem:[%s1990_s26 + $0x18] sm:$0xf] %vm1199_vm2, %v1423_v24  ;;  %v1421_v30 = vpack.c.bf16 %v1163_v28, %v1163_v28  ;;  %v1166_v31 = vsel %vm1150_vm8, %v1140_v19, %v1158_v26 }
 0x1dd   : > { %1201 = vst.msk [vmem:[%s1990_s26 + $0x4] sm:$0xf] %vm1199_vm2, %v1418_v27  ;;  %v1424_v33 = vpack.c.bf16 %v1166_v31, %v1166_v31  ;;  %vm1148_vm9 = vcmp.gt.f32.partialorder %v1132_v29, 0.0  ;;  %v1156_v34 = vmul.f32 0.1, %v1132_v29 }
 0x1de   : > { %1204 = vst.msk [vmem:[%s1990_s26 + $0x10] sm:$0xf] %vm1199_vm2, %v1421_v30 }
 0x1df   : > { %1207 = vst.msk [vmem:[%s1990_s26 + $0x1c] sm:$0xf] %vm1199_vm2, %v1424_v33  ;;  %v1164_v32 = vsel %vm1148_vm9, %v1132_v29, %v1156_v34 }
 0x1e0   : > { %v1422_v35 = vpack.c.bf16 %v1164_v32, %v1164_v32 }
 0x1e2   : > { %1205 = vst.msk [vmem:[%s1990_s26 + $0x14] sm:$0xf] %vm1199_vm2, %v1422_v35 }
 0x1e3 PF: > { %s13_s16 = sadd.s32 1, %s1548_s16   ;;  %s2031_s12 = smov %s1540_s14 }
 0x1e4   : > { %p10_p7 = scmp.ge.s32.totalorder %s13_s16, 10   ;;  %s2032_s13 = smov %s1544_s15 }
 0x1e5   : > { %s2033_s14 = smov %s2036_s17  ;;  %s2034_s15 = smov %s2040_s18 }
 0x1e6   :  { %12 = sbr.rel (!%p10_p7) target bundleno = 3 (0x3), region = 65 }

</bundles_post_ra>
